<compile_context>
chip_gen: v5e
topology: v5e:2x2
jax: 0.10.0
libtpu: 0.0.40
codegen_flags: <defaults>
</compile_context>

<pallas_src>
import functools
import math

import jax
import jax.numpy as jnp
from jax.experimental import pallas as pl
from jax.experimental.pallas import tpu as pltpu


def _causal_block_kernel(x_ref, halo_ref, w_ref, b_ref, o_ref, *,
                         kernel_size, dilation):
    """One (batch, length-tile) grid cell.

    x_ref    : (1, C_in, TL)     current length tile of x (NCL)
    halo_ref : (1, C_in, HW)     columns [tile_start - HW, tile_start) of x
    w_ref    : (K, C_out, C_in)  conv weight, tap-major, bf16
    b_ref    : (C_out, 1)        bias, f32
    o_ref    : (1, C_out, TL)    output tile
    """
    l = pl.program_id(1)
    TL = o_ref.shape[2]
    HW = halo_ref.shape[2]

    x_cur = x_ref[0].astype(jnp.bfloat16)              # (C_in, TL)
    # Zero the halo on the first tile of each sequence: causal left padding.
    keep = (l > 0).astype(jnp.bfloat16)
    halo = halo_ref[0].astype(jnp.bfloat16) * keep     # (C_in, HW)

    acc = None
    # K is small and static: unrolled Python loop, one MXU matmul per tap.
    for j in range(kernel_size):
        s = (kernel_size - 1 - j) * dilation           # how far this tap looks back
        if s == 0:
            xs = x_cur
        elif s < TL:
            xs = jnp.concatenate([halo[:, HW - s:], x_cur[:, :TL - s]], axis=-1)
        elif s == TL:                                  # only reachable when HW == TL
            xs = halo[:, HW - TL:]
        else:                                          # tap lies entirely in the causal pad
            xs = jnp.zeros_like(x_cur)
        wj = w_ref[j]                                  # (C_out, C_in) bf16
        part = jnp.dot(wj, xs, preferred_element_type=jnp.float32)
        acc = part if acc is None else acc + part      # (C_out, TL) f32

    acc = acc + b_ref[...]                             # bias in f32
    # Exact (erf-based) GELU, matching nn.GELU() default; hoisted 1/sqrt(2).
    y = 0.5 * acc * (1.0 + jax.lax.erf(acc * 0.7071067811865476))
    o_ref[0] = y.astype(o_ref.dtype)


def causal_block(x, weight, bias, *, kernel_size, dilation=1, tl_target=1024):
    """x: (B, C_in, L) float (PyTorch NCL).  Returns (B, C_out, L)."""
    B, c_in, L = x.shape
    c_out = weight.shape[0]
    assert weight.shape == (c_out, c_in, kernel_size)
    halo = (kernel_size - 1) * dilation

    # ---- length tiling (last dim stays L -> lane-dense output stores) -----
    if L <= max(tl_target, 128):
        TL, HW, num_l = L, L, 1                        # single tile per sequence
    else:
        HW = 128 * max(1, pl.cdiv(halo, 128))          # halo window, lane aligned
        TL = max(HW, (tl_target // HW) * HW)           # tile, multiple of HW (and 128)
        num_l = pl.cdiv(L, TL)
        if num_l == 1:
            TL, HW = L, L

    # VMEM budget (sized against v7x's 64 MiB; v5e/v6e have 128 MiB):
    # double-buffered f32 in/out tiles + bf16 working copies + f32 accumulator.
    est = TL * (8 * (c_in + c_out)
                + 2 * c_in * (kernel_size + 1)
                + 4 * c_out)
    vmem_limit = int(min(max(est + (4 << 20), 16 << 20), 48 << 20))

    # Weights tap-major (K, C_out, C_in) in bf16; bias as an f32 column.
    w_taps = jnp.transpose(weight, (2, 0, 1)).astype(jnp.bfloat16)
    b_col = bias.astype(jnp.float32).reshape(c_out, 1)

    ratio = TL // HW
    if num_l == 1:
        halo_map = lambda b, l: (b, 0, 0)              # always masked (l == 0)
    else:
        halo_map = lambda b, l: (b, 0, jnp.maximum(l * ratio - 1, 0))

    kern = functools.partial(_causal_block_kernel,
                             kernel_size=kernel_size, dilation=dilation)

    return pl.pallas_call(
        kern,
        out_shape=jax.ShapeDtypeStruct((B, c_out, L), x.dtype),
        grid_spec=pltpu.PrefetchScalarGridSpec(
            num_scalar_prefetch=0,
            grid=(B, num_l),
            in_specs=[
                pl.BlockSpec((1, c_in, TL), lambda b, l: (b, 0, l)),
                pl.BlockSpec((1, c_in, HW), halo_map),
                # weights/bias: constant block index -> resident, no re-DMA.
                pl.BlockSpec((kernel_size, c_out, c_in), lambda b, l: (0, 0, 0)),
                pl.BlockSpec((c_out, 1), lambda b, l: (0, 0)),
            ],
            out_specs=pl.BlockSpec((1, c_out, TL), lambda b, l: (b, 0, l)),
        ),
        compiler_params=pltpu.CompilerParams(
            dimension_semantics=("parallel", "parallel"),
            vmem_limit_bytes=vmem_limit,
        ),
    )(x, x, w_taps, b_col)


def _reference(x, weight, bias, *, kernel_size, dilation=1):
    """Pure-JAX f32 reference of CausalBlock forward (eval mode)."""
    pad = (kernel_size - 1) * dilation
    y = jax.lax.conv_general_dilated(
        x, weight,
        window_strides=(1,),
        padding=[(pad, 0)],                  # causal: pad left, no right pad
        rhs_dilation=(dilation,),
        dimension_numbers=("NCH", "OIH", "NCH"),
    )
    y = y + bias[None, :, None]
    return 0.5 * y * (1.0 + jax.lax.erf(y / jnp.sqrt(2.0)))


if __name__ == "__main__":
    key = jax.random.PRNGKey(0)
    k_x, k_w, k_b, k_x2, k_w2, k_b2 = jax.random.split(key, 6)

    # --- Test 1: small shapes, single length tile ---------------------------
    B, C_IN, C_OUT, L, KS, DIL = 2, 4, 8, 16, 3, 1
    x = jax.random.normal(k_x, (B, C_IN, L), dtype=jnp.float32)
    bound = 1.0 / math.sqrt(C_IN * KS)
    w = jax.random.uniform(k_w, (C_OUT, C_IN, KS), jnp.float32, -bound, bound)
    b = jax.random.uniform(k_b, (C_OUT,), jnp.float32, -bound, bound)

    out = jax.block_until_ready(causal_block(x, w, b, kernel_size=KS, dilation=DIL))
    ref = _reference(x, w, b, kernel_size=KS, dilation=DIL)
    assert out.shape == (B, C_OUT, L)
    # bf16 matmul inputs with f32 accumulation -> loosened tolerance vs f32 ref.
    assert jnp.allclose(out, ref, atol=2e-2, rtol=2e-2), float(jnp.max(jnp.abs(out - ref)))

    # --- Test 2: tiled length axis (halo path), dilation > 1 ----------------
    B2, C_IN2, C_OUT2, L2, KS2, DIL2 = 2, 8, 16, 384, 3, 2
    x2 = jax.random.normal(k_x2, (B2, C_IN2, L2), dtype=jnp.float32)
    bound2 = 1.0 / math.sqrt(C_IN2 * KS2)
    w2 = jax.random.uniform(k_w2, (C_OUT2, C_IN2, KS2), jnp.float32, -bound2, bound2)
    b2 = jax.random.uniform(k_b2, (C_OUT2,), jnp.float32, -bound2, bound2)

    out2 = jax.block_until_ready(
        causal_block(x2, w2, b2, kernel_size=KS2, dilation=DIL2, tl_target=128))
    ref2 = _reference(x2, w2, b2, kernel_size=KS2, dilation=DIL2)
    assert out2.shape == (B2, C_OUT2, L2)
    assert jnp.allclose(out2, ref2, atol=2e-2, rtol=2e-2), float(jnp.max(jnp.abs(out2 - ref2)))

    print("KERNEL_OK")
</pallas_src>

<mosaic_0001>
module attributes {stable_mosaic.version = 11 : i64} {
  func.func @_causal_block_kernel(%arg0: i32, %arg1: i32, %arg2: memref<1x4x16xf32, #tpu.memory_space<vmem>>, %arg3: memref<1x4x16xf32, #tpu.memory_space<vmem>>, %arg4: memref<3x8x4xbf16, #tpu.memory_space<vmem>>, %arg5: memref<8x1xf32, #tpu.memory_space<vmem>>, %arg6: memref<1x8x16xf32, #tpu.memory_space<vmem>>) attributes {dimension_semantics = [#tpu.dimension_semantics<parallel>, #tpu.dimension_semantics<parallel>], iteration_bounds = array<i64: 2, 1>, scalar_prefetch = 0 : i64, scratch_operands = 0 : i64, tpu.core_type = #tpu.core_type<tc>, window_params = [{transform_indices = @transform_0, window_bounds = array<i64: 1, 4, 16>}, {transform_indices = @transform_1, window_bounds = array<i64: 1, 4, 16>}, {pipeline_mode = #tpu.pipeline_mode<synchronous>, transform_indices = @transform_2, window_bounds = array<i64: 3, 8, 4>}, {pipeline_mode = #tpu.pipeline_mode<synchronous>, transform_indices = @transform_3, window_bounds = array<i64: 8, 1>}, {transform_indices = @transform_4, window_bounds = array<i64: 1, 8, 16>}]} {
    %c0 = arith.constant 0 : index
    %c0_0 = arith.constant 0 : index
    %c0_1 = arith.constant 0 : index
    %0 = vector.load %arg2[%c0, %c0_0, %c0_1] : memref<1x4x16xf32, #tpu.memory_space<vmem>>, vector<1x4x16xf32>
    %1 = vector.shape_cast %0 : vector<1x4x16xf32> to vector<4x16xf32>
    %2 = arith.truncf %1 : vector<4x16xf32> to vector<4x16xbf16>
    %c0_i32 = arith.constant 0 : i32
    %3 = arith.cmpi sgt, %arg1, %c0_i32 : i32
    %4 = arith.extui %3 : i1 to i32
    %5 = arith.sitofp %4 : i32 to f32
    %6 = arith.truncf %5 : f32 to bf16
    %c0_2 = arith.constant 0 : index
    %c0_3 = arith.constant 0 : index
    %c0_4 = arith.constant 0 : index
    %7 = vector.load %arg3[%c0_2, %c0_3, %c0_4] : memref<1x4x16xf32, #tpu.memory_space<vmem>>, vector<1x4x16xf32>
    %8 = vector.shape_cast %7 : vector<1x4x16xf32> to vector<4x16xf32>
    %9 = arith.truncf %8 : vector<4x16xf32> to vector<4x16xbf16>
    %10 = vector.broadcast %6 : bf16 to vector<4x16xbf16>
    %11 = arith.mulf %9, %10 : vector<4x16xbf16>
    %12 = vector.extract_strided_slice %11 {offsets = [0, 14], sizes = [4, 2], strides = [1, 1]} : vector<4x16xbf16> to vector<4x2xbf16>
    %13 = vector.extract_strided_slice %2 {offsets = [0, 0], sizes = [4, 14], strides = [1, 1]} : vector<4x16xbf16> to vector<4x14xbf16>
    %14 = tpu.concatenate %12, %13 in 1 : vector<4x2xbf16>, vector<4x14xbf16> -> vector<4x16xbf16>
    %c0_5 = arith.constant 0 : index
    %c0_6 = arith.constant 0 : index
    %c0_7 = arith.constant 0 : index
    %15 = vector.load %arg4[%c0_5, %c0_6, %c0_7] : memref<3x8x4xbf16, #tpu.memory_space<vmem>>, vector<1x8x4xbf16>
    %16 = vector.shape_cast %15 : vector<1x8x4xbf16> to vector<8x4xbf16>
    %cst = arith.constant dense<0.000000e+00> : vector<8x16xf32>
    %17 = tpu.matmul %16, %14, %cst {dimension_numbers = #tpu.dot_dimension_numbers<[1], [0], [0], [1], [0, 0, 1, 1], [], []>} : vector<8x4xbf16>, vector<4x16xbf16>, vector<8x16xf32> -> vector<8x16xf32>
    %18 = vector.extract_strided_slice %11 {offsets = [0, 15], sizes = [4, 1], strides = [1, 1]} : vector<4x16xbf16> to vector<4x1xbf16>
    %19 = vector.extract_strided_slice %2 {offsets = [0, 0], sizes = [4, 15], strides = [1, 1]} : vector<4x16xbf16> to vector<4x15xbf16>
    %20 = tpu.concatenate %18, %19 in 1 : vector<4x1xbf16>, vector<4x15xbf16> -> vector<4x16xbf16>
    %c1 = arith.constant 1 : index
    %c0_8 = arith.constant 0 : index
    %c0_9 = arith.constant 0 : index
    %21 = vector.load %arg4[%c1, %c0_8, %c0_9] : memref<3x8x4xbf16, #tpu.memory_space<vmem>>, vector<1x8x4xbf16>
    %22 = vector.shape_cast %21 : vector<1x8x4xbf16> to vector<8x4xbf16>
    %cst_10 = arith.constant dense<0.000000e+00> : vector<8x16xf32>
    %23 = tpu.matmul %22, %20, %cst_10 {dimension_numbers = #tpu.dot_dimension_numbers<[1], [0], [0], [1], [0, 0, 1, 1], [], []>} : vector<8x4xbf16>, vector<4x16xbf16>, vector<8x16xf32> -> vector<8x16xf32>
    %24 = arith.addf %17, %23 : vector<8x16xf32>
    %c2 = arith.constant 2 : index
    %c0_11 = arith.constant 0 : index
    %c0_12 = arith.constant 0 : index
    %25 = vector.load %arg4[%c2, %c0_11, %c0_12] : memref<3x8x4xbf16, #tpu.memory_space<vmem>>, vector<1x8x4xbf16>
    %26 = vector.shape_cast %25 : vector<1x8x4xbf16> to vector<8x4xbf16>
    %cst_13 = arith.constant dense<0.000000e+00> : vector<8x16xf32>
    %27 = tpu.matmul %26, %2, %cst_13 {dimension_numbers = #tpu.dot_dimension_numbers<[1], [0], [0], [1], [0, 0, 1, 1], [], []>} : vector<8x4xbf16>, vector<4x16xbf16>, vector<8x16xf32> -> vector<8x16xf32>
    %28 = arith.addf %24, %27 : vector<8x16xf32>
    %c0_14 = arith.constant 0 : index
    %c0_15 = arith.constant 0 : index
    %29 = vector.load %arg5[%c0_14, %c0_15] : memref<8x1xf32, #tpu.memory_space<vmem>>, vector<8x1xf32>
    %30 = vector.broadcast %29 : vector<8x1xf32> to vector<8x16xf32>
    %31 = arith.addf %28, %30 : vector<8x16xf32>
    %cst_16 = arith.constant 5.000000e-01 : f32
    %32 = vector.broadcast %cst_16 : f32 to vector<8x16xf32>
    %33 = arith.mulf %32, %31 : vector<8x16xf32>
    %cst_17 = arith.constant 0.707106769 : f32
    %34 = vector.broadcast %cst_17 : f32 to vector<8x16xf32>
    %35 = arith.mulf %31, %34 : vector<8x16xf32>
    %36 = math.erf %35 : vector<8x16xf32>
    %cst_18 = arith.constant 1.000000e+00 : f32
    %37 = vector.broadcast %cst_18 : f32 to vector<8x16xf32>
    %38 = arith.addf %37, %36 : vector<8x16xf32>
    %39 = arith.mulf %33, %38 : vector<8x16xf32>
    %c0_19 = arith.constant 0 : index
    %c0_20 = arith.constant 0 : index
    %c0_21 = arith.constant 0 : index
    %40 = vector.load %arg6[%c0_19, %c0_20, %c0_21] : memref<1x8x16xf32, #tpu.memory_space<vmem>>, vector<1x8x16xf32>
    %41 = vector.shape_cast %40 : vector<1x8x16xf32> to vector<8x16xf32>
    %42 = vector.shape_cast %39 : vector<8x16xf32> to vector<1x8x16xf32>
    tpu.vector_store %arg6[%c0_19, %c0_20, %c0_21], %42 {strides = array<i32>} : memref<1x8x16xf32, #tpu.memory_space<vmem>>, vector<1x8x16xf32>,
    return
  }
  func.func @transform_0(%arg0: i32, %arg1: i32) -> (i32, i32, i32) {
    %c0_i32 = arith.constant 0 : i32
    %c0_i32_0 = arith.constant 0 : i32
    return %arg0, %c0_i32, %arg1 : i32, i32, i32
  }
  func.func @transform_1(%arg0: i32, %arg1: i32) -> (i32, i32, i32) {
    %c0_i32 = arith.constant 0 : i32
    %c0_i32_0 = arith.constant 0 : i32
    %c0_i32_1 = arith.constant 0 : i32
    return %arg0, %c0_i32, %c0_i32_0 : i32, i32, i32
  }
  func.func @transform_2(%arg0: i32, %arg1: i32) -> (i32, i32, i32) {
    %c0_i32 = arith.constant 0 : i32
    %c0_i32_0 = arith.constant 0 : i32
    %c0_i32_1 = arith.constant 0 : i32
    %c0_i32_2 = arith.constant 0 : i32
    return %c0_i32, %c0_i32_0, %c0_i32_1 : i32, i32, i32
  }
  func.func @transform_3(%arg0: i32, %arg1: i32) -> (i32, i32) {
    %c0_i32 = arith.constant 0 : i32
    %c0_i32_0 = arith.constant 0 : i32
    %c0_i32_1 = arith.constant 0 : i32
    return %c0_i32, %c0_i32_0 : i32, i32
  }
  func.func @transform_4(%arg0: i32, %arg1: i32) -> (i32, i32, i32) {
    %c0_i32 = arith.constant 0 : i32
    %c0_i32_0 = arith.constant 0 : i32
    return %arg0, %c0_i32, %arg1 : i32, i32, i32
  }
}

</mosaic_0001>

<bundles_post_ra>
// kernel: tpu_custom_call.1
= control target key start
LH: loop header
LB: loop body
LE: loop exit
PB: predicated region body
PF: predicated region fallthrough
CT: control target
= control target key end

     0   :  { %9 = vsyncpa [#allocation3], 0  ;;  %s811_s0 = inlined_call_operand.vmem [shape: f32[2,4,16], index: 0, kind: input, shape index: {}]   ;;  %s812_s1 = inlined_call_operand.vmem [shape: f32[2,4,16], index: 1, kind: input, shape index: {}]   ;;  %s813_s2 = inlined_call_operand.vmem [shape: bf16[3,8,4], index: 2, kind: input, shape index: {}]   ;;  %s814_s3 = inlined_call_operand.vmem [shape: f32[8,1], index: 3, kind: input, shape index: {}]   ;;  %s815_s4 = inlined_call_operand.hbm [shape: f32[2,8,16], index: 4, kind: output, shape index: {}]  }
   0x1   :  { %11 = vsyncpa [#allocation3 + $0x1], 0  ;;  %s693_s15 = smov 0   ;;  %s695_s16 = smov 0  }
   0x2   :  { %s697_s17 = smov 0   ;;  %s699_s18 = smov 0  }
   0x3   :  { %s701_s19 = smov 0   ;;  %s703_s20 = smov 0  }
   0x4 LB: > { %s499_s21 = sadd.s32 4294967295, %s660_s20   ;;  %s500_s22 = sadd.s32 4294967294, %s660_s20   ;;  %s660_s20 = sphi %s703_s20, %s17_s20   ;;  %s656_s19 = sphi %s701_s19, %s822_s19   ;;  %s652_s18 = sphi %s699_s18, %s821_s18   ;;  %s648_s17 = sphi %s697_s17, %s820_s17   ;;  %s644_s16 = sphi %s695_s16, %s819_s16   ;;  %s640_s15 = sphi %s693_s15, %s818_s15  }
   0x5   : > { %s29_s23 = sadd.s32 1, %s656_s19  ;;  %s134_s24 = sadd.s32 1, %s648_s17 }
   0x6   : > { %p31_p0 = scmp.ge.s32.totalorder %s29_s23, 2  ;;  %p144_p1 = scmp.ne.s32.totalorder %s648_s17, %s644_s16 }
   0x7   : > { %p145_p2 = scmp.eq.s32.totalorder %s499_s21, 1  ;;  %p150_p3 = scmp.ne.s32.totalorder %s644_s16, %s640_s15 }
   0x8   : > { %s824_s23 = smov (%p31_p0, %s29_s23), 0  ;;  %p151_p5 = scmp.eq.s32.totalorder %s500_s22, 1 }
   0x9   : > { %p733_p4 = por %p145_p2, %p144_p1  ;;  %s129_s26 = ssub.s32 %s656_s19, %s824_s23 }
   0xa   : > { %p503_p6 = scmp.ge.s32.totalorder %s660_s20, 1  ;;  %p132_p7 = scmp.eq.s32.totalorder %s129_s26, 0 }
   0xb   : > { %p740_p8 = por %p151_p5, %p150_p3  ;;  %p192_p9 = scmp.lt.s32.totalorder %s660_s20, 3 }
   0xc   : > { %s746_s28 = scalar_select %p132_p7, %s648_s17, %s134_s24  }
   0xd   : > { %p193_p10 = pnand %p503_p6, %p192_p9 }
   0xe   : > { %p224_p11 = scmp.lt.s32.totalorder (!%p193_p10), %s652_s18, 1  ;;  %s663_s11 = smov (!%p193_p10), 113  }
   0xf   : > { %196 = sbr.rel (%p193_p10) target bundleno = 351 (0x15f), region = 36  ;;  %s664_s12 = smov (!%p193_p10), 114  }
  0x10   : > { %s665_s13 = smov (!%p193_p10), 1   ;;  %s666_s14 = smov (!%p193_p10), 2  }
  0x11   : > { %s514_s9 = sshll.u32 (!%p193_p10), %s652_s18, 3 }
  0x14   : > { %s225_s29 = scalar_select %p224_p11, %s652_s18, 1  ;;  %vm290_vm0 = vcmask 1041408   ;;  %v662_v3 = vmov 0.0   ;;  %vm286_vm1 = vcmask 31744   ;;  %v510_v14 = vld [vmem:[%s813_s2 + $0x8] sm:$0xf] }
  0x15   : > { %v258_v4 = vunpack.c.l.bf16 %v662_v3  ;;  %v346_v15 = vld [vmem:[%s814_s3] sm:$0xff]  ;;  %v667_v16 = vmov 0   ;;  %vm280_vm2 = vcmask 7168   ;;  %vm271_vm3 = vcmask 15360  }
  0x16   : > { %s505_s30 = sshll.u32 %s225_s29, 2  ;;  %578 = vset.pattern.permute.xlu2 %v667_v16  ;;  %579 = vset.pattern.permute.xlu0 %v667_v16  ;;  %v507_v25 = vld [vmem:[%s813_s2 + $0x4] sm:$0xf]  ;;  %v275_v26 = vld [vmem:[%s813_s2] sm:$0xf]  ;;  %vm397_vm8 = vcmask 130048  }
  0x17   : > { %s234_s7 = scalar_lea.vmem %s812_s1, %s505_s30  ;;  %s230_s10 = scalar_lea.vmem %s811_s0, %s505_s30  ;;  %349 = vperm.xlu2 %578, %v346_v15  }
  0x18   : > { %v251_v0 = vld [vmem:[%s234_s7] sm:$0xf]  ;;  %s221_s7 = sand.u32 1, %s644_s16   ;;  %s602_s30 = scalar_lea.hbm %s815_s4, 16 }
  0x19   : > { %v236_v1 = vld [vmem:[%s230_s10] sm:$0xf]  ;;  %v252_v2 = vpack.c.bf16 %v251_v0, %v251_v0  ;;  %s504_s8 = sshll.u32 %s221_s7, 3  ;;  %s400_s18 = scalar_lea.sflag [#allocation3], %s221_s7 }
  0x1a   : > { %v237_v5 = vpack.c.bf16 %v236_v1, %v236_v1 }
  0x1b   : > { %v257_v6 = vunpack.c.l.bf16 %v252_v2 }
  0x1c   : > { %v330_v7 = vsel %vm290_vm0, %v237_v5, 0  ;;  %v267_v12 = vunpack.c.l.b16 %v237_v5 }
  0x1d   : > { %339 = vmatpush.bf16.msra.mxu2 %v330_v7  ;;  %v259_v8 = vmul.f32 %v258_v4, %v257_v6 }
  0x1e   : > { %v268_v13 = vpack.c.b16 %v267_v12, %v267_v12 }
  0x1f   : > { %v260_v9 = vpack.c.bf16 %v259_v8, %v259_v8 }
  0x20   : > { %511 = vmatmul.msk.bf16.vlgmr.msra.gmra.mxu2 %vm286_vm1, %v510_v14 }
  0x21   : > { %v262_v10 = vunpack.c.l.b16 %v260_v9 }
  0x23   : > { %v263_v11 = vpack.c.b16 %v262_v10, %v262_v10 }
  0x25   : > { %276 = vrot.lane.b32.xlu1 %v263_v11, %s663_s11  ;;  %264 = vrot.lane.b32.xlu0 %v263_v11, %s664_s12  ;;  %s411_s12 = scalar_lea.hbm %s815_s4, %s514_s9 }
  0x26   : > { %s415_s21 = sshll.u32 %s411_s12, 4  ;;  %s416_s21 = int_to_ptr.hbm [resolvable:$true] %s415_s21 }
  0x27   : > { %s596_s22 = sshra.s32 %s416_s21, 4  ;;  %s597_s22 = int_to_ptr.hbm [resolvable:$true] %s596_s22 }
  0x28   : > { %s598_s24 = scalar_lea.hbm %s597_s22, 8  ;;  %p603_p1 = scmp.lt.s32.totalorder %s597_s22, %s815_s4 }
  0x29   : > { %p599_p12 = scmp.ne.s32.totalorder %s597_s22, %s598_s24  ;;  %p604_p2 = scmp.lt.s32.totalorder %s602_s30, %s598_s24 }
  0x2b   : > { %p600_p13 = pnand %p599_p12, %p733_p4  ;;  %p605_p3 = por %p604_p2, %p603_p1 }
  0x2d   : > { %278 = vrot.lane.b32.xlu1 %v268_v13, %s665_s13  ;;  %269 = vrot.lane.b32.xlu0 %v268_v13, %s666_s14  ;;  %s223_s13 = scalar_lea.vmem [#allocation2], %s504_s8  ;;  %p601_p0 = pneg %p600_p13 }
  0x2e   : > { %s413_s14 = sshll.u32 %s223_s13, 4  ;;  %s414_s14 = int_to_ptr.vmem [resolvable:$true] %s413_s14 }
  0x2f   : > { %p606_p5 = pnand %p605_p3, %p601_p0 }
  0x71   : > { %v350_v32 = vpop.permute.xlu2 %349 }
  0x97   : > { %v277_v17 = vpop.permute.xlu1 %276  ;;  %v265_v18 = vpop.permute.xlu0 %264 }
  0x9f   : > { %v279_v19 = vpop.permute.xlu1 %278  ;;  %v270_v20 = vpop.permute.xlu0 %269 }
  0xa0   : > { %v283_v21 = vsel %vm280_vm2, %v277_v17, %v279_v19  ;;  %v274_v22 = vsel %vm271_vm3, %v265_v18, %v270_v20 }
  0xa1   : > { %v291_v23 = vsel %vm290_vm0, %v283_v21, 0  ;;  %v309_v24 = vsel %vm290_vm0, %v274_v22, 0 }
  0xa2   : > { %300 = vmatpush.bf16.msra.mxu0 %v291_v23  ;;  %318 = vmatpush.bf16.msra.mxu1 %v309_v24 }
  0xa3   : > { %v341_v27 = vpop.f32.mrf.mxu2 }
  0xa5   : > { %508 = vmatmul.msk.bf16.vlgmr.msra.gmra.mxu0 %vm286_vm1, %v507_v25  ;;  %509 = vmatmul.msk.bf16.vlgmr.msra.gmra.mxu1 %vm286_vm1, %v275_v26 }
  0xab   : > { %v343_v28 = vpop.f32.mrf.mxu2 }
 0x122   : > { %v302_v29 = vpop.f32.mrf.mxu0  ;;  %v320_v30 = vpop.f32.mrf.mxu1 }
 0x123   : > { %v321_v31 = vadd.f32 %v320_v30, %v302_v29 }
 0x125   : > { %v345_v33 = vadd.f32 %v341_v27, %v321_v31 }
 0x127   : > { %v352_v34 = vadd.f32 %v350_v32, %v345_v33 }
 0x129   : > { %v354_v35 = vmul.f32 0.70710677, %v352_v34  ;;  %v353_v9 = vmul.f32 0.5, %v352_v34 }
 0x12a   : > { %v304_v36 = vpop.f32.mrf.mxu0  ;;  %v322_v37 = vpop.f32.mrf.mxu1 }
 0x12b   : > { %v355_v38 = vmul.f32 %v354_v35, %v354_v35 }
 0x12d   : > { %v356_v39 = vmin.f32 %v355_v38, 16.0 }
 0x12f   : > { %v357_v40 = vmul.f32 2.1237322e-06, %v356_v39  ;;  %v368_v41 = vmul.f32 3.8918573e-05, %v356_v39 }
 0x131   : > { %v358_v42 = vadd.f32 0.00028619796, %v357_v40  ;;  %v369_v43 = vadd.f32 0.001143296, %v368_v41 }
 0x133   : > { %v359_v44 = vmul.f32 %v358_v42, %v356_v39  ;;  %v370_v45 = vmul.f32 %v369_v43, %v356_v39 }
 0x135   : > { %v371_v46 = vadd.f32 0.014752088, %v370_v45  ;;  %v360_v47 = vadd.f32 0.0036580483, %v359_v44 }
 0x137   : > { %v372_v48 = vmul.f32 %v371_v46, %v356_v39  ;;  %v361_v50 = vmul.f32 %v360_v47, %v356_v39 }
 0x139   : > { %v373_v49 = vadd.f32 0.112945676, %v372_v48  ;;  %v362_v53 = vadd.f32 0.05243302, %v361_v50 }
 0x13b   : > { %v374_v51 = vmul.f32 %v373_v49, %v356_v39  ;;  %v363_v56 = vmul.f32 %v362_v53, %v356_v39 }
 0x13d   : > { %v375_v52 = vadd.f32 0.4994258, %v374_v51  ;;  %v364_v57 = vadd.f32 0.18741608, %v363_v56 }
 0x13f   : > { %v376_v54 = vmul.f32 %v375_v52, %v356_v39  ;;  %v365_v59 = vmul.f32 %v364_v57, %v356_v39 }
 0x141   : > { %v377_v55 = vadd.f32 1.0, %v376_v54  ;;  %v366_v63 = vadd.f32 1.1283791, %v365_v59 }
 0x143   : > { %580 = vrcp.f32 %v377_v55  ;;  %v389_v62 = vand.u32 2147483648, %v377_v55  ;;  %v387_v1 = vand.u32 2147483647, %v377_v55  ;;  %vm383_vm5 = vweird.f32 %v377_v55 }
 0x144   : > { %v367_v4 = vmul.f32 %v366_v63, %v354_v35 }
 0x145   : > { %v390_v3 = vor.u32 1.1754944e-38, %v389_v62  ;;  %vm388_vm7 = vcmp.eq.f32.partialorder %v387_v1, 8.507059e+37 }
 0x149   : > { %v581_v58 = vpop.eup %580 }
 0x14a   : > { %v379_v60 = vmul.f32 %v581_v58, %v377_v55  ;;  %vm384_vm4 = vweird.f32 %v581_v58 }
 0x14b   : > { %vm385_vm6 = vmor %vm383_vm5, %vm384_vm4 }
 0x14c   : > { %v380_v61 = vsub.f32 1.0, %v379_v60 }
 0x14e   : > { %v381_v0 = vmul.f32 %v581_v58, %v380_v61 }
 0x150   : > { %v382_v2 = vadd.f32 %v581_v58, %v381_v0 }
 0x152   : > { %v386_v5 = vsel %vm385_vm6, %v581_v58, %v382_v2 }
 0x153   : > { %v391_v6 = vsel %vm388_vm7, %v390_v3, %v386_v5 }
 0x154   : > { %v392_v7 = vmul.f32 %v391_v6, %v367_v4 }
 0x156   : > { %v512_v8 = vclamps-f32 %v392_v7, 1.0 }
 0x158   : > { %v395_v10 = vadd.f32 1.0, %v512_v8 }
 0x15a   : > { %v396_v11 = vmul.f32 %v395_v10, %v353_v9 }
 0x15c   : > { %398 = vst.msk [vmem:[%s223_s13] sm:$0xff] %vm397_vm8, %v396_v11 }
 0x15d   : > { %609 = shalt.err (!%p606_p5)
}
 0x15e   : > { %517 = dma.vmem_to_hbm [thread:$0]  (%p733_p4), %s414_s14, 128, %s416_s21, %s400_s18  }
 0x15f PF: > { %p523_p6 = scmp.ge.s32.totalorder %s660_s20, 2  ;;  %s427_s7 = sand.u32 1, %s640_s15  }
 0x160   : > { %s428_s8 = scalar_lea.sflag [#allocation3], %s427_s7 }
 0x161   : > { %p520_p7 = pnand %p523_p6, %p740_p8 }
 0x163   : > { %p521_p9 = pneg %p520_p7 }
 0x165   : > { %635 = dma.done.wait (%p521_p9), %s428_s8, 128  }
 0x166   : > { %637 = vsyncadd (%p521_p9), %s428_s8, 4294967168  ;;  %s17_s20 = sadd.s32 1, %s660_s20   ;;  %s818_s15 = smov %s644_s16 }
 0x167   : > { %p14_p10 = scmp.ge.s32.totalorder %s17_s20, 4   ;;  %s819_s16 = smov %s648_s17 }
 0x168   : > { %s820_s17 = smov %s746_s28  ;;  %s821_s18 = smov %s656_s19 }
 0x169   : > { %s822_s19 = smov %s824_s23  ;;  %16 = sbr.rel (!%p14_p10) target bundleno = 4 (0x4), region = 76 }
 0x16e   :  { %434 = vsyncpa [#allocation3], 1 }
 0x16f   :  { %436 = vsyncpa [#allocation3 + $0x1], 1 }

</bundles_post_ra>
